<compile_context>
chip_gen: v5e
topology: v5e:2x2
jax: 0.10.0
libtpu: 0.0.40
codegen_flags: <defaults>
</compile_context>

<pallas_src>
import jax
import jax.numpy as jnp
from jax.experimental import pallas as pl
from jax.experimental.pallas import tpu as pltpu


def _round_up(x, m):
    return ((x + m - 1) // m) * m


# --------------------------------------------------------------------------
# Stage 1: per-node-tile feature transforms (X@W0 + bias, X@W1)
# --------------------------------------------------------------------------
def feature_transform_kernel(x_ref, w0_ref, w1_ref, b_ref, xw0b_ref, xw1_ref):
    x = x_ref[...]
    xw0b_ref[...] = (
        jnp.dot(x, w0_ref[...], preferred_element_type=jnp.float32) + b_ref[...]
    )
    xw1_ref[...] = jnp.dot(
        x, w1_ref[...], preferred_element_type=jnp.float32
    ).astype(jnp.bfloat16)


# --------------------------------------------------------------------------
# Stage 2: propagation  out = XW0B + A_hat @ XW1   (tiled reduction over k)
# --------------------------------------------------------------------------
def propagate_kernel(a_ref, xw1_ref, xw0b_ref, o_ref, acc_ref):
    k = pl.program_id(1)

    @pl.when(k == 0)
    def _():
        # Fold in the k=0 TAGConv term + bias once per row tile.
        acc_ref[...] = xw0b_ref[...]

    acc_ref[...] += jnp.dot(
        a_ref[...], xw1_ref[...], preferred_element_type=jnp.float32
    )

    @pl.when(k == pl.num_programs(1) - 1)
    def _():
        o_ref[...] = acc_ref[...]


# --------------------------------------------------------------------------
# Wrapper: padding, tiling, pallas_call plumbing
# --------------------------------------------------------------------------
def tagconv_forward(a_hat, x, w0, w1, bias, *, max_tile=512):
    n, f_in = x.shape
    f_out = w0.shape[1]

    f_in_p = _round_up(f_in, 128)
    f_out_p = _round_up(f_out, 128)

    # Node tile: big enough to stream A_hat near the HBM roofline, small enough
    # to fit double-buffered in every generation's scoped VMEM default.
    tile = min(max_tile, _round_up(n, 128))
    n_p = _round_up(n, tile)

    # Lane/sublane-dense zero padding (padded rows/cols contribute nothing).
    x_p = jnp.zeros((n_p, f_in_p), jnp.float32).at[:n, :f_in].set(x)
    w0_p = jnp.zeros((f_in_p, f_out_p), jnp.float32).at[:f_in, :f_out].set(w0)
    w1_p = jnp.zeros((f_in_p, f_out_p), jnp.float32).at[:f_in, :f_out].set(w1)
    b_p = jnp.zeros((1, f_out_p), jnp.float32).at[:, :f_out].set(bias)
    # A_hat dominates HBM traffic -> stream it as bf16.
    a_p = (
        jnp.zeros((n_p, n_p), jnp.bfloat16)
        .at[:n, :n]
        .set(a_hat.astype(jnp.bfloat16))
    )

    n_tiles = n_p // tile

    # ---- Stage 1: feature transform over node tiles -------------------------
    xw0b, xw1 = pl.pallas_call(
        feature_transform_kernel,
        out_shape=(
            jax.ShapeDtypeStruct((n_p, f_out_p), jnp.float32),
            jax.ShapeDtypeStruct((n_p, f_out_p), jnp.bfloat16),
        ),
        grid=(n_tiles,),
        in_specs=[
            pl.BlockSpec((tile, f_in_p), lambda i: (i, 0)),
            pl.BlockSpec((f_in_p, f_out_p), lambda i: (0, 0)),   # resident weights
            pl.BlockSpec((f_in_p, f_out_p), lambda i: (0, 0)),
            pl.BlockSpec((1, f_out_p), lambda i: (0, 0)),        # resident bias
        ],
        out_specs=(
            pl.BlockSpec((tile, f_out_p), lambda i: (i, 0)),
            pl.BlockSpec((tile, f_out_p), lambda i: (i, 0)),
        ),
        compiler_params=pltpu.CompilerParams(dimension_semantics=("parallel",)),
    )(x_p, w0_p, w1_p, b_p)

    # ---- Stage 2: tiled A_hat @ XW1 with resident accumulator ---------------
    out_p = pl.pallas_call(
        propagate_kernel,
        out_shape=jax.ShapeDtypeStruct((n_p, f_out_p), jnp.float32),
        grid=(n_tiles, n_tiles),
        in_specs=[
            pl.BlockSpec((tile, tile), lambda i, k: (i, k)),       # A_hat stream
            pl.BlockSpec((tile, f_out_p), lambda i, k: (k, 0)),    # XW1 k-tile
            pl.BlockSpec((tile, f_out_p), lambda i, k: (i, 0)),    # XW0B row tile
        ],
        out_specs=pl.BlockSpec((tile, f_out_p), lambda i, k: (i, 0)),
        scratch_shapes=[pltpu.VMEM((tile, f_out_p), jnp.float32)],
        compiler_params=pltpu.CompilerParams(
            dimension_semantics=("parallel", "arbitrary"),
        ),
    )(a_p, xw1, xw0b)

    return out_p[:n, :f_out]


# --------------------------------------------------------------------------
# Glue: dense symmetric GCN normalization of edge_index
# --------------------------------------------------------------------------
def gcn_norm_dense(edge_index, num_nodes):
    """Densify edge_index with symmetric GCN normalization (no added self-loops).

    Matches PyG gcn_norm(add_self_loops=False) followed by sum-aggregation of
    norm * x_j at the target node.
    """
    # TODO(synk): for large sparse graphs replace this O(N^2) dense adjacency
    # with a scalar-prefetch / CSR-blocked SpMM formulation.
    row, col = edge_index[0], edge_index[1]          # edges j -> i
    ew = jnp.ones(row.shape[0], dtype=jnp.float32)
    deg = jnp.zeros(num_nodes, dtype=jnp.float32).at[col].add(ew)
    deg_inv_sqrt = jnp.where(deg > 0, 1.0 / jnp.sqrt(deg), 0.0)
    norm = deg_inv_sqrt[row] * ew * deg_inv_sqrt[col]
    a = jnp.zeros((num_nodes, num_nodes), dtype=jnp.float32)
    a = a.at[col, row].add(norm)                     # out[i] = sum_j A[i, j] * x[j]
    return a


class GCNPallas:
    """JAX/Pallas equivalent of GCN(input_dim, output_dim, K=1)."""

    def __init__(self, input_dim, output_dim, K=1, key=None):
        assert K == 1, "this synthetic kernel implements the module default K=1"
        if key is None:
            key = jax.random.PRNGKey(0)
        k0, k1, kb = jax.random.split(key, 3)
        scale = 1.0 / jnp.sqrt(jnp.float32(input_dim))
        # weights stored as [F_in, F_out] (transposed vs torch Linear's [out, in])
        self.w0 = jax.random.normal(k0, (input_dim, output_dim), jnp.float32) * scale
        self.w1 = jax.random.normal(k1, (input_dim, output_dim), jnp.float32) * scale
        self.bias = jax.random.normal(kb, (1, output_dim), jnp.float32) * 0.01

    def __call__(self, x, edge_index):
        a_hat = gcn_norm_dense(edge_index, x.shape[0])
        return tagconv_forward(a_hat, x, self.w0, self.w1, self.bias)


if __name__ == "__main__":
    N, F_IN, F_OUT = 16, 8, 16

    key = jax.random.PRNGKey(0)
    kx, kp = jax.random.split(key)

    # node features [N, F_in]
    x = jax.random.normal(kx, (N, F_IN), jnp.float32)

    # deterministic undirected ring graph: edges i<->(i+1) mod N, shape [2, 2N]
    src = jnp.arange(N, dtype=jnp.int32)
    dst = (src + 1) % N
    edge_index = jnp.concatenate(
        [jnp.stack([src, dst], axis=0), jnp.stack([dst, src], axis=0)], axis=1
    )

    model = GCNPallas(F_IN, F_OUT, K=1, key=kp)
    out = model(x, edge_index)
    out = jax.block_until_ready(out)

    # reference check in plain JAX (f32 everywhere; kernel uses bf16 A_hat/XW1)
    a_hat = gcn_norm_dense(edge_index, N)
    ref = x @ model.w0 + (a_hat @ x) @ model.w1 + model.bias
    assert out.shape == (N, F_OUT)
    assert jnp.allclose(out, ref, atol=3e-2, rtol=3e-2), (
        float(jnp.max(jnp.abs(out - ref)))
    )

    print("KERNEL_OK")
</pallas_src>

<mosaic_0001>
module attributes {stable_mosaic.version = 11 : i64} {
  func.func @feature_transform_kernel(%arg0: i32, %arg1: memref<128x128xf32, #tpu.memory_space<vmem>>, %arg2: memref<128x128xf32, #tpu.memory_space<vmem>>, %arg3: memref<128x128xf32, #tpu.memory_space<vmem>>, %arg4: memref<1x128xf32, #tpu.memory_space<vmem>>, %arg5: memref<128x128xf32, #tpu.memory_space<vmem>>, %arg6: memref<128x128xbf16, #tpu.memory_space<vmem>>) attributes {dimension_semantics = [#tpu.dimension_semantics<parallel>], iteration_bounds = array<i64: 1>, scalar_prefetch = 0 : i64, scratch_operands = 0 : i64, tpu.core_type = #tpu.core_type<tc>, window_params = [{transform_indices = @transform_0, window_bounds = array<i64: 128, 128>}, {pipeline_mode = #tpu.pipeline_mode<synchronous>, transform_indices = @transform_1, window_bounds = array<i64: 128, 128>}, {pipeline_mode = #tpu.pipeline_mode<synchronous>, transform_indices = @transform_2, window_bounds = array<i64: 128, 128>}, {pipeline_mode = #tpu.pipeline_mode<synchronous>, transform_indices = @transform_3, window_bounds = array<i64: 1, 128>}, {transform_indices = @transform_4, window_bounds = array<i64: 128, 128>}, {transform_indices = @transform_5, window_bounds = array<i64: 128, 128>}]} {
    %c0 = arith.constant 0 : index
    %c0_0 = arith.constant 0 : index
    %0 = vector.load %arg1[%c0, %c0_0] : memref<128x128xf32, #tpu.memory_space<vmem>>, vector<128x128xf32>
    %c0_1 = arith.constant 0 : index
    %c0_2 = arith.constant 0 : index
    %1 = vector.load %arg2[%c0_1, %c0_2] : memref<128x128xf32, #tpu.memory_space<vmem>>, vector<128x128xf32>
    %cst = arith.constant dense<0.000000e+00> : vector<128x128xf32>
    %2 = tpu.matmul %0, %1, %cst {dimension_numbers = #tpu.dot_dimension_numbers<[1], [0], [0], [1], [0, 0, 1, 1], [], []>} : vector<128x128xf32>, vector<128x128xf32>, vector<128x128xf32> -> vector<128x128xf32>
    %c0_3 = arith.constant 0 : index
    %c0_4 = arith.constant 0 : index
    %3 = vector.load %arg4[%c0_3, %c0_4] : memref<1x128xf32, #tpu.memory_space<vmem>>, vector<1x128xf32>
    %4 = vector.broadcast %3 : vector<1x128xf32> to vector<128x128xf32>
    %5 = arith.addf %2, %4 : vector<128x128xf32>
    %c0_5 = arith.constant 0 : index
    %c0_6 = arith.constant 0 : index
    %6 = vector.load %arg5[%c0_5, %c0_6] : memref<128x128xf32, #tpu.memory_space<vmem>>, vector<128x128xf32>
    tpu.vector_store %arg5[%c0_5, %c0_6], %5 {strides = array<i32>} : memref<128x128xf32, #tpu.memory_space<vmem>>, vector<128x128xf32>,
    %c0_7 = arith.constant 0 : index
    %c0_8 = arith.constant 0 : index
    %7 = vector.load %arg3[%c0_7, %c0_8] : memref<128x128xf32, #tpu.memory_space<vmem>>, vector<128x128xf32>
    %cst_9 = arith.constant dense<0.000000e+00> : vector<128x128xf32>
    %8 = tpu.matmul %0, %7, %cst_9 {dimension_numbers = #tpu.dot_dimension_numbers<[1], [0], [0], [1], [0, 0, 1, 1], [], []>} : vector<128x128xf32>, vector<128x128xf32>, vector<128x128xf32> -> vector<128x128xf32>
    %9 = arith.truncf %8 : vector<128x128xf32> to vector<128x128xbf16>
    %c0_10 = arith.constant 0 : index
    %c0_11 = arith.constant 0 : index
    %10 = vector.load %arg6[%c0_10, %c0_11] : memref<128x128xbf16, #tpu.memory_space<vmem>>, vector<128x128xbf16>
    tpu.vector_store %arg6[%c0_10, %c0_11], %9 {strides = array<i32>} : memref<128x128xbf16, #tpu.memory_space<vmem>>, vector<128x128xbf16>,
    return
  }
  func.func @transform_0(%arg0: i32) -> (i32, i32) {
    %c0_i32 = arith.constant 0 : i32
    %c0_i32_0 = arith.constant 0 : i32
    return %arg0, %c0_i32 : i32, i32
  }
  func.func @transform_1(%arg0: i32) -> (i32, i32) {
    %c0_i32 = arith.constant 0 : i32
    %c0_i32_0 = arith.constant 0 : i32
    %c0_i32_1 = arith.constant 0 : i32
    return %c0_i32, %c0_i32_0 : i32, i32
  }
  func.func @transform_2(%arg0: i32) -> (i32, i32) {
    %c0_i32 = arith.constant 0 : i32
    %c0_i32_0 = arith.constant 0 : i32
    %c0_i32_1 = arith.constant 0 : i32
    return %c0_i32, %c0_i32_0 : i32, i32
  }
  func.func @transform_3(%arg0: i32) -> (i32, i32) {
    %c0_i32 = arith.constant 0 : i32
    %c0_i32_0 = arith.constant 0 : i32
    %c0_i32_1 = arith.constant 0 : i32
    return %c0_i32, %c0_i32_0 : i32, i32
  }
  func.func @transform_4(%arg0: i32) -> (i32, i32) {
    %c0_i32 = arith.constant 0 : i32
    %c0_i32_0 = arith.constant 0 : i32
    return %arg0, %c0_i32 : i32, i32
  }
  func.func @transform_5(%arg0: i32) -> (i32, i32) {
    %c0_i32 = arith.constant 0 : i32
    %c0_i32_0 = arith.constant 0 : i32
    return %arg0, %c0_i32 : i32, i32
  }
}

</mosaic_0001>

<bundles_post_ra>
// kernel: tpu_custom_call.1
= control target key start
LH: loop header
LB: loop body
LE: loop exit
PB: predicated region body
PF: predicated region fallthrough
CT: control target
= control target key end

     0   :  { %11 = vsyncpa [#allocation3], 0  ;;  %s640_s0 = inlined_call_operand.hbm [shape: f32[128,128], index: 0, kind: input, shape index: {}]   ;;  %s641_s1 = inlined_call_operand.hbm [shape: f32[128,128], index: 1, kind: input, shape index: {}]   ;;  %s642_s2 = inlined_call_operand.hbm [shape: f32[128,128], index: 2, kind: input, shape index: {}]   ;;  %s643_s3 = inlined_call_operand.vmem [shape: f32[1,128], index: 3, kind: input, shape index: {}]   ;;  %s644_s4 = inlined_call_operand.hbm [shape: f32[128,128], index: 4, kind: output, shape index: {0}]   ;;  %s645_s5 = inlined_call_operand.hbm [shape: bf16[128,128], index: 5, kind: output, shape index: {1}]  }
   0x1   :  { %12 = vsyncpa [#allocation6], 0 }
   0x2   :  { %13 = vsyncpa [#allocation4], 0 }
   0x3   :  { %14 = vsyncpa [#allocation10], 0  ;;  %s32_s20 = sshll.u32 %s641_s1, 4  ;;  %s553_s21 = smov [#allocation5]   ;;  %s33_s20 = int_to_ptr.hbm [resolvable:$true] %s32_s20 }
   0x4   :  { %s34_s22 = sshll.u32 %s553_s21, 4  ;;  %s19_s25 = sshll.u32 %s640_s0, 4  ;;  %s35_s22 = int_to_ptr.vmem [resolvable:$true] %s34_s22  ;;  %s20_s25 = int_to_ptr.hbm [resolvable:$true] %s19_s25 }
   0x5   :  { %s554_s26 = smov 128   ;;  %s555_s27 = smov 8  }
   0x6   :  { %40 = dma.hbm_to_vmem [thread:$0]  %s33_s20, 2048, %s35_s22, [#allocation6], %s554_s26, %s554_s26, %s555_s27  }
   0x7   :  { %s556_s28 = smov [#allocation2]   ;;  %s45_s1 = sshll.u32 %s642_s2, 4  ;;  %s46_s1 = int_to_ptr.hbm [resolvable:$true] %s45_s1 }
   0x8   :  { %s21_s29 = sshll.u32 %s556_s28, 4  ;;  %s557_s0 = smov [#allocation7]   ;;  %s22_s29 = int_to_ptr.vmem [resolvable:$true] %s21_s29 }
   0x9   :  { %27 = dma.hbm_to_vmem [thread:$0]  %s20_s25, 2048, %s22_s29, [#allocation3], %s554_s26, %s554_s26, %s555_s27  }
   0xa   :  { %s47_s7 = sshll.u32 %s557_s0, 4  ;;  %s48_s7 = int_to_ptr.vmem [resolvable:$true] %s47_s7 }
   0xb   :  { %53 = dma.hbm_to_vmem [thread:$0]  %s46_s1, 2048, %s48_s7, [#allocation6], %s554_s26, %s554_s26, %s555_s27  }
   0xc   :  { %545 = dma.done.wait [#allocation3], 2048  }
   0xd   :  { %546 = vsyncadd [#allocation3], 4294965248 }
   0xe   :  { %547 = dma.done.wait [#allocation6], 4096  }
   0xf   :  { %548 = vsyncadd [#allocation6], 4294963200  ;;  %v99_v0 = vld [vmem:[#allocation5 + $0x78] sm:$0xff]  ;;  %v98_v2 = vld [vmem:[#allocation5 + $0x70] sm:$0xff]  ;;  %s304_s12 = sshll.u32 %s644_s4, 4  ;;  %s559_s13 = smov [#allocation9]   ;;  %s305_s12 = int_to_ptr.hbm [resolvable:$true] %s304_s12 }
  0x10   :  { %v200_v1 = vld [vmem:[#allocation7 + $0x78] sm:$0xff]  ;;  %383 = vmatpush.msra.mxu2 %v99_v0  ;;  %v199_v3 = vld [vmem:[#allocation7 + $0x70] sm:$0xff]  ;;  %v97_v4 = vld [vmem:[#allocation5 + $0x68] sm:$0xff]  ;;  %104 = vmatpush.msra.mxu0 %v99_v0  ;;  %s315_s14 = sshll.u32 %s559_s13, 4  ;;  %s317_s17 = sshll.u32 %s645_s5, 4  ;;  %s316_s14 = int_to_ptr.vmem [resolvable:$true] %s315_s14  ;;  %s318_s17 = int_to_ptr.hbm [resolvable:$true] %s317_s17 }
  0x11   :  { %201 = vmatpush.msra.mxu1 %v200_v1  ;;  %399 = vmatpush.msra.mxu3 %v200_v1  ;;  %v198_v5 = vld [vmem:[#allocation7 + $0x68] sm:$0xff]  ;;  %v96_v6 = vld [vmem:[#allocation5 + $0x60] sm:$0xff]  ;;  %v95_v8 = vld [vmem:[#allocation5 + $0x58] sm:$0xff]  ;;  %s560_s4 = smov 64   ;;  %s561_s18 = smov 4  }
  0x12   :  { %384 = vmatpush.msra.mxu2 %v98_v2  ;;  %v197_v7 = vld [vmem:[#allocation7 + $0x60] sm:$0xff]  ;;  %105 = vmatpush.msra.mxu0 %v98_v2  ;;  %v196_v9 = vld [vmem:[#allocation7 + $0x58] sm:$0xff]  ;;  %v94_v10 = vld [vmem:[#allocation5 + $0x50] sm:$0xff] }
  0x13   :  { %202 = vmatpush.msra.mxu1 %v199_v3  ;;  %400 = vmatpush.msra.mxu3 %v199_v3  ;;  %v195_v11 = vld [vmem:[#allocation7 + $0x50] sm:$0xff]  ;;  %v93_v12 = vld [vmem:[#allocation5 + $0x48] sm:$0xff]  ;;  %v92_v14 = vld [vmem:[#allocation5 + $0x40] sm:$0xff] }
  0x14   :  { %385 = vmatpush.msra.mxu2 %v97_v4  ;;  %106 = vmatpush.msra.mxu0 %v97_v4  ;;  %v194_v13 = vld [vmem:[#allocation7 + $0x48] sm:$0xff]  ;;  %v193_v15 = vld [vmem:[#allocation7 + $0x40] sm:$0xff]  ;;  %v91_v16 = vld [vmem:[#allocation5 + $0x38] sm:$0xff] }
  0x15   :  { %203 = vmatpush.msra.mxu1 %v198_v5  ;;  %401 = vmatpush.msra.mxu3 %v198_v5  ;;  %v192_v17 = vld [vmem:[#allocation7 + $0x38] sm:$0xff]  ;;  %v90_v18 = vld [vmem:[#allocation5 + $0x30] sm:$0xff]  ;;  %v89_v20 = vld [vmem:[#allocation5 + $0x28] sm:$0xff] }
  0x16   :  { %386 = vmatpush.msra.mxu2 %v96_v6  ;;  %107 = vmatpush.msra.mxu0 %v96_v6  ;;  %v191_v19 = vld [vmem:[#allocation7 + $0x30] sm:$0xff]  ;;  %v190_v21 = vld [vmem:[#allocation7 + $0x28] sm:$0xff]  ;;  %v88_v22 = vld [vmem:[#allocation5 + $0x20] sm:$0xff] }
  0x17   :  { %204 = vmatpush.msra.mxu1 %v197_v7  ;;  %402 = vmatpush.msra.mxu3 %v197_v7  ;;  %v189_v23 = vld [vmem:[#allocation7 + $0x20] sm:$0xff]  ;;  %v87_v24 = vld [vmem:[#allocation5 + $0x18] sm:$0xff]  ;;  %v86_v26 = vld [vmem:[#allocation5 + $0x10] sm:$0xff] }
  0x18   :  { %387 = vmatpush.msra.mxu2 %v95_v8  ;;  %108 = vmatpush.msra.mxu0 %v95_v8  ;;  %v188_v25 = vld [vmem:[#allocation7 + $0x18] sm:$0xff]  ;;  %v187_v27 = vld [vmem:[#allocation7 + $0x10] sm:$0xff]  ;;  %v85_v28 = vld [vmem:[#allocation5 + $0x8] sm:$0xff] }
  0x19   :  { %205 = vmatpush.msra.mxu1 %v196_v9  ;;  %403 = vmatpush.msra.mxu3 %v196_v9  ;;  %v186_v29 = vld [vmem:[#allocation7 + $0x8] sm:$0xff]  ;;  %v84_v30 = vld [vmem:[#allocation5] sm:$0xff]  ;;  %v78_v36 = vld [vmem:[#allocation2 + $0x50] sm:$0xff] }
  0x1a   :  { %388 = vmatpush.msra.mxu2 %v94_v10  ;;  %109 = vmatpush.msra.mxu0 %v94_v10  ;;  %v185_v31 = vld [vmem:[#allocation7] sm:$0xff]  ;;  %v77_v34 = vld [vmem:[#allocation2 + $0x48] sm:$0xff]  ;;  %v70_v37 = vld [vmem:[#allocation2 + $0x10] sm:$0xff] }
  0x1b   :  { %206 = vmatpush.msra.mxu1 %v195_v11  ;;  %404 = vmatpush.msra.mxu3 %v195_v11  ;;  %v76_v32 = vld [vmem:[#allocation2 + $0x40] sm:$0xff]  ;;  %v69_v35 = vld [vmem:[#allocation2 + $0x8] sm:$0xff]  ;;  %v79_v38 = vld [vmem:[#allocation2 + $0x58] sm:$0xff] }
  0x1c   :  { %389 = vmatpush.msra.mxu2 %v93_v12  ;;  %110 = vmatpush.msra.mxu0 %v93_v12  ;;  %v68_v33 = vld [vmem:[#allocation2] sm:$0xff]  ;;  %v71_v39 = vld [vmem:[#allocation2 + $0x18] sm:$0xff]  ;;  %v81_v42 = vld [vmem:[#allocation2 + $0x68] sm:$0xff] }
  0x1d   :  { %207 = vmatpush.msra.mxu1 %v194_v13  ;;  %405 = vmatpush.msra.mxu3 %v194_v13  ;;  %v80_v40 = vld [vmem:[#allocation2 + $0x60] sm:$0xff]  ;;  %v73_v43 = vld [vmem:[#allocation2 + $0x28] sm:$0xff]  ;;  %v82_v44 = vld [vmem:[#allocation2 + $0x70] sm:$0xff] }
  0x1e   :  { %390 = vmatpush.msra.mxu2 %v92_v14  ;;  %111 = vmatpush.msra.mxu0 %v92_v14  ;;  %v72_v41 = vld [vmem:[#allocation2 + $0x20] sm:$0xff]  ;;  %v74_v45 = vld [vmem:[#allocation2 + $0x30] sm:$0xff]  ;;  %v83_v46 = vld [vmem:[#allocation2 + $0x78] sm:$0xff] }
  0x1f   :  { %208 = vmatpush.msra.mxu1 %v193_v15  ;;  %406 = vmatpush.msra.mxu3 %v193_v15  ;;  %v75_v47 = vld [vmem:[#allocation2 + $0x38] sm:$0xff]  ;;  %v613_v48 = vld [vmem:[%s643_s3] ss:$0 sm:$0xff]  ;;  %s558_s3 = smov [#allocation8]  }
  0x20   :  { %391 = vmatpush.msra.mxu2 %v91_v16  ;;  %112 = vmatpush.msra.mxu0 %v91_v16  ;;  %s302_s9 = sshll.u32 %s558_s3, 4  ;;  %s303_s9 = int_to_ptr.vmem [resolvable:$true] %s302_s9 }
  0x21   :  { %209 = vmatpush.msra.mxu1 %v192_v17  ;;  %407 = vmatpush.msra.mxu3 %v192_v17 }
  0x22   :  { %392 = vmatpush.msra.mxu2 %v90_v18  ;;  %113 = vmatpush.msra.mxu0 %v90_v18 }
  0x23   :  { %210 = vmatpush.msra.mxu1 %v191_v19  ;;  %408 = vmatpush.msra.mxu3 %v191_v19 }
  0x24   :  { %393 = vmatpush.msra.mxu2 %v89_v20  ;;  %114 = vmatpush.msra.mxu0 %v89_v20 }
  0x25   :  { %211 = vmatpush.msra.mxu1 %v190_v21  ;;  %409 = vmatpush.msra.mxu3 %v190_v21 }
  0x26   :  { %394 = vmatpush.msra.mxu2 %v88_v22  ;;  %115 = vmatpush.msra.mxu0 %v88_v22 }
  0x27   :  { %212 = vmatpush.msra.mxu1 %v189_v23  ;;  %410 = vmatpush.msra.mxu3 %v189_v23 }
  0x28   :  { %395 = vmatpush.msra.mxu2 %v87_v24  ;;  %116 = vmatpush.msra.mxu0 %v87_v24 }
  0x29   :  { %213 = vmatpush.msra.mxu1 %v188_v25  ;;  %411 = vmatpush.msra.mxu3 %v188_v25 }
  0x2a   :  { %396 = vmatpush.msra.mxu2 %v86_v26  ;;  %117 = vmatpush.msra.mxu0 %v86_v26 }
  0x2b   :  { %214 = vmatpush.msra.mxu1 %v187_v27  ;;  %412 = vmatpush.msra.mxu3 %v187_v27 }
  0x2c   :  { %397 = vmatpush.msra.mxu2 %v85_v28  ;;  %118 = vmatpush.msra.mxu0 %v85_v28 }
  0x2d   :  { %215 = vmatpush.msra.mxu1 %v186_v29  ;;  %413 = vmatpush.msra.mxu3 %v186_v29 }
  0x2e   :  { %398 = vmatpush.msra.mxu2 %v84_v30  ;;  %119 = vmatpush.msra.mxu0 %v84_v30 }
  0x2f   :  { %216 = vmatpush.msra.mxu1 %v185_v31  ;;  %414 = vmatpush.msra.mxu3 %v185_v31 }
  0x30   :  { %144 = vmatmul.f32.vlgmr.msra.gmra.mxu2 %v76_v32  ;;  %217 = vmatmul.f32.vlgmr.msra.gmra.mxu1 %v68_v33 }
  0x31   :  { %241 = vmatmul.f32.vlgmr.msra.gmra.mxu3 %v76_v32  ;;  %120 = vmatmul.f32.vlgmr.msra.gmra.mxu0 %v68_v33 }
  0x38   :  { %147 = vmatmul.f32.gmra.mxu2 %v77_v34  ;;  %220 = vmatmul.f32.gmra.mxu1 %v69_v35 }
  0x39   :  { %244 = vmatmul.f32.gmra.mxu3 %v77_v34  ;;  %123 = vmatmul.f32.gmra.mxu0 %v69_v35 }
  0x40   :  { %150 = vmatmul.f32.gmra.mxu2 %v78_v36  ;;  %223 = vmatmul.f32.gmra.mxu1 %v70_v37 }
  0x41   :  { %247 = vmatmul.f32.gmra.mxu3 %v78_v36  ;;  %126 = vmatmul.f32.gmra.mxu0 %v70_v37 }
  0x48   :  { %153 = vmatmul.f32.gmra.mxu2 %v79_v38  ;;  %226 = vmatmul.f32.gmra.mxu1 %v71_v39 }
  0x49   :  { %250 = vmatmul.f32.gmra.mxu3 %v79_v38  ;;  %129 = vmatmul.f32.gmra.mxu0 %v71_v39 }
  0x50   :  { %156 = vmatmul.f32.gmra.mxu2 %v80_v40  ;;  %229 = vmatmul.f32.gmra.mxu1 %v72_v41 }
  0x51   :  { %253 = vmatmul.f32.gmra.mxu3 %v80_v40  ;;  %132 = vmatmul.f32.gmra.mxu0 %v72_v41 }
  0x58   :  { %159 = vmatmul.f32.gmra.mxu2 %v81_v42  ;;  %232 = vmatmul.f32.gmra.mxu1 %v73_v43 }
  0x59   :  { %256 = vmatmul.f32.gmra.mxu3 %v81_v42  ;;  %135 = vmatmul.f32.gmra.mxu0 %v73_v43 }
  0x60   :  { %162 = vmatmul.f32.gmra.mxu2 %v82_v44  ;;  %235 = vmatmul.f32.gmra.mxu1 %v74_v45 }
  0x61   :  { %259 = vmatmul.f32.gmra.mxu3 %v82_v44  ;;  %138 = vmatmul.f32.gmra.mxu0 %v74_v45 }
  0x68   :  { %165 = vmatmul.f32.gmra.mxu2 %v83_v46  ;;  %238 = vmatmul.f32.gmra.mxu1 %v75_v47 }
  0x69   :  { %262 = vmatmul.f32.gmra.mxu3 %v83_v46  ;;  %141 = vmatmul.f32.gmra.mxu0 %v75_v47 }
  0xad   :  { %v218_v49 = vpop.f32.mrf.mxu1 }
  0xae   :  { %v121_v50 = vpop.f32.mrf.mxu0 }
  0xaf   :  { %v122_v51 = vadd.f32 %v613_v48, %v121_v50 }
  0xb1   :  { %169 = vst [vmem:[#allocation8] sm:$0xff] %v122_v51 }
  0xb3   :  { %v145_v52 = vpop.f32.mrf.mxu2 }
  0xb4   :  { %v146_v53 = vadd.f32 %v613_v48, %v145_v52  ;;  %v242_v54 = vpop.f32.mrf.mxu3 }
  0xb5   :  { %v221_v55 = vpop.f32.mrf.mxu1 }
  0xb6   :  { %177 = vst [vmem:[#allocation8 + $0x40] sm:$0xff] %v146_v53  ;;  %v339_v56 = vpack.c.bf16 %v221_v55, %v218_v49  ;;  %v124_v57 = vpop.f32.mrf.mxu0 }
  0xb7   :  { %v125_v58 = vadd.f32 %v613_v48, %v124_v57 }
  0xb8   :  { %340 = vst [vmem:[#allocation9] sm:$0xff] %v339_v56  }
  0xb9   :  { %170 = vst [vmem:[#allocation8 + $0x8] sm:$0xff] %v125_v58 }
  0xbb   :  { %v148_v59 = vpop.f32.mrf.mxu2 }
  0xbc   :  { %v149_v60 = vadd.f32 %v613_v48, %v148_v59  ;;  %v245_v61 = vpop.f32.mrf.mxu3 }
  0xbd   :  { %v359_v62 = vpack.c.bf16 %v245_v61, %v242_v54  ;;  %v224_v63 = vpop.f32.mrf.mxu1 }
  0xbe   :  { %178 = vst [vmem:[#allocation8 + $0x48] sm:$0xff] %v149_v60  ;;  %v127_v0 = vpop.f32.mrf.mxu0 }
  0xbf   :  { %379 = vst [vmem:[#allocation9 + $0x20] sm:$0xff] %v359_v62   ;;  %v128_v1 = vadd.f32 %v613_v48, %v127_v0 }
  0xc1   :  { %171 = vst [vmem:[#allocation8 + $0x10] sm:$0xff] %v128_v1 }
  0xc3   :  { %v151_v2 = vpop.f32.mrf.mxu2 }
  0xc4   :  { %v152_v3 = vadd.f32 %v613_v48, %v151_v2  ;;  %v248_v4 = vpop.f32.mrf.mxu3 }
  0xc5   :  { %v227_v5 = vpop.f32.mrf.mxu1 }
  0xc6   :  { %179 = vst [vmem:[#allocation8 + $0x50] sm:$0xff] %v152_v3  ;;  %v344_v6 = vpack.c.bf16 %v227_v5, %v224_v63  ;;  %v130_v7 = vpop.f32.mrf.mxu0 }
  0xc7   :  { %v131_v8 = vadd.f32 %v613_v48, %v130_v7 }
  0xc8   :  { %376 = vst [vmem:[#allocation9 + $0x8] sm:$0xff] %v344_v6  }
  0xc9   :  { %172 = vst [vmem:[#allocation8 + $0x18] sm:$0xff] %v131_v8 }
  0xcb   :  { %v154_v9 = vpop.f32.mrf.mxu2 }
  0xcc   :  { %v155_v10 = vadd.f32 %v613_v48, %v154_v9  ;;  %v251_v11 = vpop.f32.mrf.mxu3 }
  0xcd   :  { %v364_v12 = vpack.c.bf16 %v251_v11, %v248_v4  ;;  %v230_v13 = vpop.f32.mrf.mxu1 }
  0xce   :  { %180 = vst [vmem:[#allocation8 + $0x58] sm:$0xff] %v155_v10  ;;  %v133_v14 = vpop.f32.mrf.mxu0 }
  0xcf   :  { %380 = vst [vmem:[#allocation9 + $0x28] sm:$0xff] %v364_v12   ;;  %v134_v15 = vadd.f32 %v613_v48, %v133_v14 }
  0xd1   :  { %173 = vst [vmem:[#allocation8 + $0x20] sm:$0xff] %v134_v15 }
  0xd3   :  { %v157_v16 = vpop.f32.mrf.mxu2 }
  0xd4   :  { %v158_v17 = vadd.f32 %v613_v48, %v157_v16  ;;  %v254_v18 = vpop.f32.mrf.mxu3 }
  0xd5   :  { %v233_v19 = vpop.f32.mrf.mxu1 }
  0xd6   :  { %181 = vst [vmem:[#allocation8 + $0x60] sm:$0xff] %v158_v17  ;;  %v349_v20 = vpack.c.bf16 %v233_v19, %v230_v13  ;;  %v136_v21 = vpop.f32.mrf.mxu0 }
  0xd7   :  { %v137_v22 = vadd.f32 %v613_v48, %v136_v21 }
  0xd8   :  { %377 = vst [vmem:[#allocation9 + $0x10] sm:$0xff] %v349_v20  }
  0xd9   :  { %174 = vst [vmem:[#allocation8 + $0x28] sm:$0xff] %v137_v22 }
  0xdb   :  { %v160_v23 = vpop.f32.mrf.mxu2 }
  0xdc   :  { %v161_v24 = vadd.f32 %v613_v48, %v160_v23  ;;  %v257_v25 = vpop.f32.mrf.mxu3 }
  0xdd   :  { %v369_v26 = vpack.c.bf16 %v257_v25, %v254_v18  ;;  %v236_v27 = vpop.f32.mrf.mxu1 }
  0xde   :  { %182 = vst [vmem:[#allocation8 + $0x68] sm:$0xff] %v161_v24  ;;  %v139_v28 = vpop.f32.mrf.mxu0 }
  0xdf   :  { %381 = vst [vmem:[#allocation9 + $0x30] sm:$0xff] %v369_v26   ;;  %v140_v29 = vadd.f32 %v613_v48, %v139_v28 }
  0xe1   :  { %175 = vst [vmem:[#allocation8 + $0x30] sm:$0xff] %v140_v29 }
  0xe3   :  { %v163_v30 = vpop.f32.mrf.mxu2 }
  0xe4   :  { %v164_v31 = vadd.f32 %v613_v48, %v163_v30  ;;  %v260_v32 = vpop.f32.mrf.mxu3 }
  0xe5   :  { %v239_v33 = vpop.f32.mrf.mxu1 }
  0xe6   :  { %183 = vst [vmem:[#allocation8 + $0x70] sm:$0xff] %v164_v31  ;;  %v354_v34 = vpack.c.bf16 %v239_v33, %v236_v27  ;;  %v142_v35 = vpop.f32.mrf.mxu0 }
  0xe7   :  { %v143_v36 = vadd.f32 %v613_v48, %v142_v35 }
  0xe8   :  { %378 = vst [vmem:[#allocation9 + $0x18] sm:$0xff] %v354_v34  }
  0xe9   :  { %176 = vst [vmem:[#allocation8 + $0x38] sm:$0xff] %v143_v36 }
  0xeb   :  { %v166_v37 = vpop.f32.mrf.mxu2 }
  0xec   :  { %v167_v38 = vadd.f32 %v613_v48, %v166_v37  ;;  %v263_v39 = vpop.f32.mrf.mxu3 }
  0xed   :  { %v374_v40 = vpack.c.bf16 %v263_v39, %v260_v32 }
  0xee   :  { %184 = vst [vmem:[#allocation8 + $0x78] sm:$0xff] %v167_v38 }
  0xef   :  { %382 = vst [vmem:[#allocation9 + $0x38] sm:$0xff] %v374_v40   ;;  %310 = dma.vmem_to_hbm [thread:$0]  %s303_s9, 2048, %s305_s12, [#allocation4], %s554_s26, %s554_s26, %s555_s27  }
  0xf0   :  { %323 = dma.vmem_to_hbm [thread:$0]  %s316_s14, 1024, %s318_s17, [#allocation10], %s560_s4, %s560_s4, %s561_s18  }
  0xf1   :  { %549 = dma.done.wait [#allocation4], 2048  }
  0xf2   :  { %550 = vsyncadd [#allocation4], 4294965248 }
  0xf3   :  { %551 = dma.done.wait [#allocation10], 1024  }
  0xf4   :  { %552 = vsyncadd [#allocation10], 4294966272 }
  0xf5   :  { %332 = vsyncpa [#allocation3], 1 }
  0xf6   :  { %333 = vsyncpa [#allocation6], 1 }
  0xf7   :  { %334 = vsyncpa [#allocation4], 1 }
  0xf8   :  { %335 = vsyncpa [#allocation10], 1 }

</bundles_post_ra>
